<compile_context>
chip_gen: v5e
topology: v5e:2x2
jax: 0.10.0
libtpu: 0.0.40
codegen_flags: <defaults>
</compile_context>

<pallas_src>
import functools
import math

import jax
import jax.numpy as jnp
import numpy as np
from jax.experimental import pallas as pl
from jax.experimental.pallas import tpu as pltpu


def _round_up(x, m):
    return (x + m - 1) // m * m


def _bmm_s8_kernel(a_ref, bt_ref, o_ref, *, g, use_int_mxu):
    # a_ref:  (g, tm, tk) int8   -- LHS tiles for g batches
    # bt_ref: (g, tk, tn) int8   -- RHS tiles, already (K, N) in HBM
    # o_ref:  (g, tm, tn) int32  -- output tile, resident across the K axis;
    #                              doubles as the accumulator (no scratch).
    k = pl.program_id(3)
    is_first = k == 0

    # g is small and static -> fully unrolled.
    for i in range(g):
        if use_int_mxu:
            # Native int8 MXU path with exact int32 accumulation (v2..v6).
            part = jax.lax.dot_general(
                a_ref[i], bt_ref[i],
                dimension_numbers=(((1,), (0,)), ((), ())),
                preferred_element_type=jnp.int32,
            )
        else:
            # bf16 MXU path (v7x-class / unknown chips): int8 values are exact
            # in bf16; a per-tile f32 partial is exact while tk <= 1024 and the
            # cross-tile accumulation happens in int32, so the result is exact
            # for any total K.
            part = jax.lax.dot_general(
                a_ref[i].astype(jnp.bfloat16),
                bt_ref[i].astype(jnp.bfloat16),
                dimension_numbers=(((1,), (0,)), ((), ())),
                preferred_element_type=jnp.float32,
            ).astype(jnp.int32)

        @pl.when(is_first)
        def _init(part=part, i=i):
            o_ref[i] = part          # first K tile: plain store, no zero-fill

        @pl.when(k != 0)
        def _acc(part=part, i=i):
            o_ref[i] = o_ref[i] + part


def bmm_s8t_s8n_s32t(a, b, *, block_m=512, block_n=512, block_k=512,
                     batch_block=None):
    """a: (B, M, K) int8, b: (B, N, K) int8 -> (B, M, N) int32 = a @ b^T."""
    B, M, K = a.shape
    Bb, N, Kb = b.shape
    assert B == Bb and K == Kb, "shape mismatch"
    assert a.dtype == jnp.int8 and b.dtype == jnp.int8, "int8 inputs expected"

    # Capability dispatch: the integer MXU exists through v6; any unknown /
    # newer device kind (e.g. "TPU7x") takes the bf16-operand path, which is
    # correct on every TPU generation.
    kind = jax.devices()[0].device_kind.lower()
    use_int_mxu = any(v in kind for v in ("v2", "v3", "v4", "v5", "v6"))
    is_v5e = ("v5 lite" in kind) or ("v5e" in kind)

    # Generation-aware VMEM sizing (128 MiB on v5e/v6e, 64 MiB on v7x-class).
    vmem_cap = None
    try:
        vmem_cap = getattr(pltpu.get_tpu_info(), "vmem_capacity_bytes", None)
    except Exception:
        vmem_cap = None
    if not vmem_cap:
        vmem_cap = (128 << 20) if use_int_mxu else (64 << 20)
    vmem_limit = min(int(vmem_cap) * 3 // 4, 100 << 20)   # ~96 MiB / ~48 MiB
    vmem_budget = vmem_limit * 2 // 3                      # headroom for Mosaic

    # Tile sizes: int8 sublane multiples of 32, lane multiples of 128; the
    # int32 output stays lane-dense (tn multiple of 128) so stores are plain
    # unmasked vst.
    tm = min(block_m, _round_up(M, 32))
    tn = min(block_n, _round_up(N, 128))
    tk = min(block_k, _round_up(K, 128))
    if not use_int_mxu:
        tk = min(tk, 1024)   # keep per-tile f32 partials exactly representable

    Mp = _round_up(M, tm)
    Np = _round_up(N, tn)
    Kp = _round_up(K, tk)

    # Batches per grid step: enough MXU work per step to hide the ~0.35us
    # grid-step overhead, bounded only by the VMEM budget (inputs and output
    # double-buffered; no accumulator scratch). Batch is padded to a multiple
    # of g, so g never has to divide B.
    per_batch_bytes = 2 * (tm * tk + tk * tn) + 2 * (tm * tn * 4)
    per_batch_flops = 2 * tm * tn * tk
    flops_target = 70e6 if is_v5e else 400e6
    if batch_block is None:
        g_want = max(1, int(math.ceil(flops_target / per_batch_flops)))
        g_vmem = max(1, vmem_budget // per_batch_bytes)
        g = int(max(1, min(B, g_want, g_vmem)))
        # Multi-TC chips (bf16 path): keep >= 2 parallel grid steps when the
        # M/N grids collapse to 1, so both TensorCores get work.
        if (not use_int_mxu) and (Mp // tm) * (Np // tn) == 1 and B >= 2:
            g = min(g, max(1, B // 2))
    else:
        g = int(batch_block)
    Bp = _round_up(B, g)

    # Pad to tile multiples. Padded K columns are zeros (exact); padded
    # batch/M/N entries are sliced off afterwards.
    a_p = a
    if (Bp, Mp, Kp) != (B, M, K):
        a_p = jnp.pad(a, ((0, Bp - B), (0, Mp - M), (0, Kp - K)))
    b_p = b
    if (Bp, Np, Kp) != (B, N, K):
        b_p = jnp.pad(b, ((0, Bp - B), (0, Np - N), (0, Kp - K)))
    # One HBM relayout of the RHS to (B, K, N): the kernel then feeds the MXU
    # the canonical (M,K)x(K,N) form and never transposes packed int8 tiles.
    # TODO(synk): for skinny-M shapes, benchmark Mosaic's transposed-RHS
    # dot_general ((g, tn, tk) blocks, contracting dims (1, 1)) against this
    # extra HBM round trip and select per-shape.
    bt = jnp.transpose(b_p, (0, 2, 1))

    grid = (Bp // g, Mp // tm, Np // tn, Kp // tk)
    kernel = functools.partial(_bmm_s8_kernel, g=g, use_int_mxu=use_int_mxu)

    cost = pl.CostEstimate(
        flops=2 * B * M * N * K,
        transcendentals=0,
        bytes_accessed=B * (M * K + N * K + 4 * M * N),
    )

    out_p = pl.pallas_call(
        kernel,
        out_shape=jax.ShapeDtypeStruct((Bp, Mp, Np), jnp.int32),
        grid_spec=pltpu.PrefetchScalarGridSpec(
            num_scalar_prefetch=0,
            grid=grid,
            in_specs=[
                pl.BlockSpec((g, tm, tk), lambda bi, mi, ni, ki: (bi, mi, ki)),
                pl.BlockSpec((g, tk, tn), lambda bi, mi, ni, ki: (bi, ki, ni)),
            ],
            out_specs=pl.BlockSpec((g, tm, tn),
                                   lambda bi, mi, ni, ki: (bi, mi, ni)),
        ),
        compiler_params=pltpu.CompilerParams(
            dimension_semantics=("parallel", "parallel", "parallel", "arbitrary"),
            vmem_limit_bytes=vmem_limit,
        ),
        cost_estimate=cost,
    )(a_p, bt)

    if (Bp, Mp, Np) != (B, M, N):
        out_p = out_p[:B, :M, :N]
    return out_p


class BMM_S8T_S8N_S32T:
    """JAX/Pallas port of triton_int BMM_S8T_S8N_S32T (int32 output, no scale)."""

    def __call__(self, a, b):
        return bmm_s8t_s8n_s32t(a, b)


if __name__ == "__main__":
    key = jax.random.PRNGKey(0)
    k1, k2, k3, k4 = jax.random.split(key, 4)

    module = BMM_S8T_S8N_S32T()

    # Test 1: small attention-like shapes (B = batch*heads, M/N = seq, K = head_dim).
    B, M, N, K = 4, 16, 32, 64
    a = jax.random.randint(k1, (B, M, K), -128, 128, dtype=jnp.int32).astype(jnp.int8)
    b = jax.random.randint(k2, (B, N, K), -128, 128, dtype=jnp.int32).astype(jnp.int8)
    out = jax.block_until_ready(module(a, b))
    ref = np.einsum("bmk,bnk->bmn",
                    np.asarray(a, dtype=np.int32), np.asarray(b, dtype=np.int32))
    assert out.shape == (B, M, N) and out.dtype == jnp.int32
    assert np.array_equal(np.asarray(out), ref), "test1 mismatch vs reference"

    # Test 2: ragged shapes exercising padding and the K-tiled accumulator path.
    B2, M2, N2, K2 = 3, 70, 200, 300
    a2 = jax.random.randint(k3, (B2, M2, K2), -128, 128, dtype=jnp.int32).astype(jnp.int8)
    b2 = jax.random.randint(k4, (B2, N2, K2), -128, 128, dtype=jnp.int32).astype(jnp.int8)
    out2 = jax.block_until_ready(module(a2, b2))
    ref2 = np.einsum("bmk,bnk->bmn",
                     np.asarray(a2, dtype=np.int32), np.asarray(b2, dtype=np.int32))
    assert out2.shape == (B2, M2, N2) and out2.dtype == jnp.int32
    assert np.array_equal(np.asarray(out2), ref2), "test2 mismatch vs reference"

    print("KERNEL_OK")
</pallas_src>

<mosaic_0001>
module attributes {stable_mosaic.version = 11 : i64} {
  func.func @_bmm_s8_kernel(%arg0: i32, %arg1: i32, %arg2: i32, %arg3: i32, %arg4: memref<2x32x128xi8, #tpu.memory_space<vmem>>, %arg5: memref<2x128x128xi8, #tpu.memory_space<vmem>>, %arg6: memref<2x32x128xi32, #tpu.memory_space<vmem>>) attributes {dimension_semantics = [#tpu.dimension_semantics<parallel>, #tpu.dimension_semantics<parallel>, #tpu.dimension_semantics<parallel>, #tpu.dimension_semantics<arbitrary>], iteration_bounds = array<i64: 2, 1, 1, 1>, scalar_prefetch = 0 : i64, scratch_operands = 0 : i64, tpu.core_type = #tpu.core_type<tc>, window_params = [{transform_indices = @transform_0, window_bounds = array<i64: 2, 32, 128>}, {transform_indices = @transform_1, window_bounds = array<i64: 2, 128, 128>}, {transform_indices = @transform_2, window_bounds = array<i64: 2, 32, 128>}]} {
    %c0_i32 = arith.constant 0 : i32
    %0 = arith.cmpi eq, %arg3, %c0_i32 : i32
    %c0 = arith.constant 0 : index
    %c0_0 = arith.constant 0 : index
    %c0_1 = arith.constant 0 : index
    %1 = vector.load %arg4[%c0, %c0_0, %c0_1] : memref<2x32x128xi8, #tpu.memory_space<vmem>>, vector<1x32x128xi8>
    %2 = vector.shape_cast %1 : vector<1x32x128xi8> to vector<32x128xi8>
    %3 = arith.sitofp %2 : vector<32x128xi8> to vector<32x128xbf16>
    %c0_2 = arith.constant 0 : index
    %c0_3 = arith.constant 0 : index
    %c0_4 = arith.constant 0 : index
    %4 = vector.load %arg5[%c0_2, %c0_3, %c0_4] : memref<2x128x128xi8, #tpu.memory_space<vmem>>, vector<1x128x128xi8>
    %5 = vector.shape_cast %4 : vector<1x128x128xi8> to vector<128x128xi8>
    %6 = arith.sitofp %5 : vector<128x128xi8> to vector<128x128xbf16>
    %cst = arith.constant dense<0.000000e+00> : vector<32x128xf32>
    %7 = tpu.matmul %3, %6, %cst {dimension_numbers = #tpu.dot_dimension_numbers<[1], [0], [0], [1], [0, 0, 1, 1], [], []>} : vector<32x128xbf16>, vector<128x128xbf16>, vector<32x128xf32> -> vector<32x128xf32>
    %8 = arith.fptosi %7 : vector<32x128xf32> to vector<32x128xi32>
    %9 = arith.extui %0 : i1 to i32
    %c0_i32_5 = arith.constant 0 : i32
    %10 = arith.cmpi ne, %9, %c0_i32_5 : i32
    scf.if %10 {
      %c0_17 = arith.constant 0 : index
      %c0_18 = arith.constant 0 : index
      %c0_19 = arith.constant 0 : index
      %27 = vector.load %arg6[%c0_17, %c0_18, %c0_19] : memref<2x32x128xi32, #tpu.memory_space<vmem>>, vector<1x32x128xi32>
      %28 = vector.shape_cast %27 : vector<1x32x128xi32> to vector<32x128xi32>
      %29 = vector.shape_cast %8 : vector<32x128xi32> to vector<1x32x128xi32>
      tpu.vector_store %arg6[%c0_17, %c0_18, %c0_19], %29 {strides = array<i32>} : memref<2x32x128xi32, #tpu.memory_space<vmem>>, vector<1x32x128xi32>,
    } else {
    }
    %c0_i32_6 = arith.constant 0 : i32
    %11 = arith.cmpi ne, %arg3, %c0_i32_6 : i32
    %12 = arith.extui %11 : i1 to i32
    %c0_i32_7 = arith.constant 0 : i32
    %13 = arith.cmpi ne, %12, %c0_i32_7 : i32
    scf.if %13 {
      %c0_17 = arith.constant 0 : index
      %c0_18 = arith.constant 0 : index
      %c0_19 = arith.constant 0 : index
      %27 = vector.load %arg6[%c0_17, %c0_18, %c0_19] : memref<2x32x128xi32, #tpu.memory_space<vmem>>, vector<1x32x128xi32>
      %28 = vector.shape_cast %27 : vector<1x32x128xi32> to vector<32x128xi32>
      %29 = arith.addi %28, %8 : vector<32x128xi32>
      %c0_20 = arith.constant 0 : index
      %c0_21 = arith.constant 0 : index
      %c0_22 = arith.constant 0 : index
      %30 = vector.load %arg6[%c0_20, %c0_21, %c0_22] : memref<2x32x128xi32, #tpu.memory_space<vmem>>, vector<1x32x128xi32>
      %31 = vector.shape_cast %30 : vector<1x32x128xi32> to vector<32x128xi32>
      %32 = vector.shape_cast %29 : vector<32x128xi32> to vector<1x32x128xi32>
      tpu.vector_store %arg6[%c0_20, %c0_21, %c0_22], %32 {strides = array<i32>} : memref<2x32x128xi32, #tpu.memory_space<vmem>>, vector<1x32x128xi32>,
    } else {
    }
    %c1 = arith.constant 1 : index
    %c0_8 = arith.constant 0 : index
    %c0_9 = arith.constant 0 : index
    %14 = vector.load %arg4[%c1, %c0_8, %c0_9] : memref<2x32x128xi8, #tpu.memory_space<vmem>>, vector<1x32x128xi8>
    %15 = vector.shape_cast %14 : vector<1x32x128xi8> to vector<32x128xi8>
    %16 = arith.sitofp %15 : vector<32x128xi8> to vector<32x128xbf16>
    %c1_10 = arith.constant 1 : index
    %c0_11 = arith.constant 0 : index
    %c0_12 = arith.constant 0 : index
    %17 = vector.load %arg5[%c1_10, %c0_11, %c0_12] : memref<2x128x128xi8, #tpu.memory_space<vmem>>, vector<1x128x128xi8>
    %18 = vector.shape_cast %17 : vector<1x128x128xi8> to vector<128x128xi8>
    %19 = arith.sitofp %18 : vector<128x128xi8> to vector<128x128xbf16>
    %cst_13 = arith.constant dense<0.000000e+00> : vector<32x128xf32>
    %20 = tpu.matmul %16, %19, %cst_13 {dimension_numbers = #tpu.dot_dimension_numbers<[1], [0], [0], [1], [0, 0, 1, 1], [], []>} : vector<32x128xbf16>, vector<128x128xbf16>, vector<32x128xf32> -> vector<32x128xf32>
    %21 = arith.fptosi %20 : vector<32x128xf32> to vector<32x128xi32>
    %22 = arith.extui %0 : i1 to i32
    %c0_i32_14 = arith.constant 0 : i32
    %23 = arith.cmpi ne, %22, %c0_i32_14 : i32
    scf.if %23 {
      %c1_17 = arith.constant 1 : index
      %c0_18 = arith.constant 0 : index
      %c0_19 = arith.constant 0 : index
      %27 = vector.load %arg6[%c1_17, %c0_18, %c0_19] : memref<2x32x128xi32, #tpu.memory_space<vmem>>, vector<1x32x128xi32>
      %28 = vector.shape_cast %27 : vector<1x32x128xi32> to vector<32x128xi32>
      %29 = vector.shape_cast %21 : vector<32x128xi32> to vector<1x32x128xi32>
      tpu.vector_store %arg6[%c1_17, %c0_18, %c0_19], %29 {strides = array<i32>} : memref<2x32x128xi32, #tpu.memory_space<vmem>>, vector<1x32x128xi32>,
    } else {
    }
    %c0_i32_15 = arith.constant 0 : i32
    %24 = arith.cmpi ne, %arg3, %c0_i32_15 : i32
    %25 = arith.extui %24 : i1 to i32
    %c0_i32_16 = arith.constant 0 : i32
    %26 = arith.cmpi ne, %25, %c0_i32_16 : i32
    scf.if %26 {
      %c1_17 = arith.constant 1 : index
      %c0_18 = arith.constant 0 : index
      %c0_19 = arith.constant 0 : index
      %27 = vector.load %arg6[%c1_17, %c0_18, %c0_19] : memref<2x32x128xi32, #tpu.memory_space<vmem>>, vector<1x32x128xi32>
      %28 = vector.shape_cast %27 : vector<1x32x128xi32> to vector<32x128xi32>
      %29 = arith.addi %28, %21 : vector<32x128xi32>
      %c1_20 = arith.constant 1 : index
      %c0_21 = arith.constant 0 : index
      %c0_22 = arith.constant 0 : index
      %30 = vector.load %arg6[%c1_20, %c0_21, %c0_22] : memref<2x32x128xi32, #tpu.memory_space<vmem>>, vector<1x32x128xi32>
      %31 = vector.shape_cast %30 : vector<1x32x128xi32> to vector<32x128xi32>
      %32 = vector.shape_cast %29 : vector<32x128xi32> to vector<1x32x128xi32>
      tpu.vector_store %arg6[%c1_20, %c0_21, %c0_22], %32 {strides = array<i32>} : memref<2x32x128xi32, #tpu.memory_space<vmem>>, vector<1x32x128xi32>,
    } else {
    }
    return
  }
  func.func @transform_0(%arg0: i32, %arg1: i32, %arg2: i32, %arg3: i32) -> (i32, i32, i32) {
    %c0_i32 = arith.constant 0 : i32
    return %arg0, %arg1, %arg3 : i32, i32, i32
  }
  func.func @transform_1(%arg0: i32, %arg1: i32, %arg2: i32, %arg3: i32) -> (i32, i32, i32) {
    %c0_i32 = arith.constant 0 : i32
    return %arg0, %arg3, %arg2 : i32, i32, i32
  }
  func.func @transform_2(%arg0: i32, %arg1: i32, %arg2: i32, %arg3: i32) -> (i32, i32, i32) {
    %c0_i32 = arith.constant 0 : i32
    return %arg0, %arg1, %arg2 : i32, i32, i32
  }
}

</mosaic_0001>

<bundles_post_ra>
// kernel: tpu_custom_call.1
= control target key start
LH: loop header
LB: loop body
LE: loop exit
PB: predicated region body
PF: predicated region fallthrough
CT: control target
= control target key end

     0   :  { %7 = vsyncpa [#allocation3], 0  ;;  %s1112_s0 = inlined_call_operand.hbm [shape: s8[4,32,128], index: 0, kind: input, shape index: {}]   ;;  %s1113_s1 = inlined_call_operand.hbm [shape: s8[4,128,128], index: 1, kind: input, shape index: {}]   ;;  %s1114_s2 = inlined_call_operand.hbm [shape: s32[4,32,128], index: 2, kind: output, shape index: {}]  }
   0x1   :  { %9 = vsyncpa [#allocation3 + $0x1], 0 }
   0x2   :  { %10 = vsyncpa [#allocation6], 0 }
   0x3   :  { %12 = vsyncpa [#allocation6 + $0x1], 0 }
   0x4   :  { %13 = vsyncpa [#allocation4], 0 }
   0x5   :  { %15 = vsyncpa [#allocation4 + $0x1], 0  ;;  %s939_s9 = smov 0   ;;  %s941_s10 = smov 0  }
   0x6   :  { %s943_s11 = smov 0   ;;  %s945_s12 = smov 0  }
   0x7   :  { %s947_s13 = smov 0   ;;  %s949_s14 = smov 0  }
   0x8 LB: > { %s602_s15 = sadd.s32 4294967295, %s918_s14   ;;  %s603_s16 = sadd.s32 4294967294, %s918_s14   ;;  %s918_s14 = sphi %s949_s14, %s21_s14   ;;  %s914_s13 = sphi %s947_s13, %s1124_s13   ;;  %s910_s12 = sphi %s945_s12, %s1123_s12   ;;  %s906_s11 = sphi %s943_s11, %s1122_s11   ;;  %s902_s10 = sphi %s941_s10, %s1121_s10   ;;  %s898_s9 = sphi %s939_s9, %s1120_s9  }
   0x9   : > { %s47_s17 = sadd.s32 1, %s914_s13  ;;  %s58_s18 = sadd.s32 1, %s906_s11 }
   0xa   : > { %p49_p0 = scmp.ge.s32.totalorder %s47_s17, 2  ;;  %p65_p1 = scmp.ne.s32.totalorder %s906_s11, %s902_s10 }
   0xb   : > { %p66_p2 = scmp.eq.s32.totalorder %s918_s14, 0  ;;  %p71_p3 = scmp.ne.s32.totalorder %s902_s10, %s898_s9 }
   0xc   : > { %s1126_s17 = smov (%p49_p0, %s47_s17), 0  ;;  %p72_p5 = scmp.eq.s32.totalorder %s602_s15, 0 }
   0xd   : > { %p980_p4 = por %p66_p2, %p65_p1  ;;  %s51_s20 = ssub.s32 %s914_s13, %s1126_s17 }
   0xe   : > { %p129_p6 = scmp.eq.s32.totalorder %s602_s15, 1  ;;  %p56_p7 = scmp.eq.s32.totalorder %s51_s20, 0 }
   0xf   : > { %p986_p8 = por %p72_p5, %p71_p3  ;;  %p135_p10 = scmp.eq.s32.totalorder %s603_s16, 1 }
  0x10   : > { %p990_p9 = por %p129_p6, %p65_p1  ;;  %p605_p12 = scmp.ge.s32.totalorder %s918_s14, 2 }
  0x11   : > { %s995_s23 = scalar_select %p56_p7, %s906_s11, %s58_s18  }
  0x12   : > { %p997_p11 = por %p135_p10, %p71_p3  ;;  %p718_p13 = scmp.lt.s32.totalorder %s918_s14, 2 }
  0x13   : > { %s1004_s25 = sand.u32 1, %s906_s11   ;;  %s640_s27 = sshll.u32 %s914_s13, 4 }
  0x14   : > { %s606_s26 = sshll.u32 %s1004_s25, 4  ;;  %s166_s30 = scalar_lea.hbm %s1112_s0, %s640_s27 }
  0x15   : > { %s159_s3 = scalar_lea.vmem [#allocation2], %s606_s26  ;;  %s167_s5 = sshll.u32 %s166_s30, 4  ;;  %s168_s5 = int_to_ptr.hbm [resolvable:$true] %s167_s5 }
  0x16   : > { %s169_s4 = sshll.u32 %s159_s3, 4  ;;  %p1013_p0 = pnand %p718_p13, %p980_p4  ;;  %s170_s4 = int_to_ptr.vmem [resolvable:$true] %s169_s4 }
  0x17   : > { %p613_p1 = scmp.ge.s32.totalorder %s918_s14, 1  ;;  %s156_s7 = scalar_lea.sflag [#allocation3], %s1004_s25 }
  0x18   : > { %s920_s8 = smov 128   ;;  %s921_s15 = smov 8  }
  0x19   : > { %710 = dma.hbm_to_vmem [thread:$0]  (!%p1013_p0), %s168_s5, 256, %s170_s4, %s156_s7, %s920_s8, %s920_s8, %s921_s15  }
  0x1a   : > { %p203_p2 = scmp.lt.s32.totalorder %s918_s14, 3  ;;  %s609_s16 = sshll.u32 %s1004_s25, 6 }
  0x1b   : > { %s642_s18 = sshll.u32 %s914_s13, 6  ;;  %s183_s27 = scalar_lea.vmem [#allocation5], %s609_s16 }
  0x1c   : > { %p204_p3 = pnand %p613_p1, %p203_p2  ;;  %s192_s19 = scalar_lea.hbm %s1113_s1, %s642_s18 }
  0x1d   : > { %s195_s28 = sshll.u32 %s183_s27, 4  ;;  %s193_s29 = sshll.u32 %s192_s19, 4  ;;  %s196_s28 = int_to_ptr.vmem [resolvable:$true] %s195_s28  ;;  %s194_s29 = int_to_ptr.hbm [resolvable:$true] %s193_s29 }
  0x1e   : > { %s180_s30 = scalar_lea.sflag [#allocation6], %s1004_s25  ;;  %207 = sbr.rel (%p204_p3) target bundleno = 227 (0xe3), region = 28 }
  0x1f   : > { %713 = dma.hbm_to_vmem [thread:$0]  (!%p1013_p0), %s194_s29, 1024, %s196_s28, %s180_s30, %s920_s8, %s920_s8, %s921_s15  }
  0x20   : > { %s1031_s3 = sand.u32 (!%p204_p3), 1, %s902_s10  }
  0x21   : > { %s614_s4 = sshll.u32 (!%p204_p3), %s1031_s3, 4  ;;  %s210_s5 = scalar_lea.sflag (!%p204_p3), [#allocation3], %s1031_s3 }
  0x22   : > { %s1035_s7 = scalar_lea.vmem (!%p204_p3), [#allocation2], %s614_s4 }
  0x23   : > { %885 = dma.done.wait (%p986_p8), %s210_s5, 256  }
  0x24   : > { %887 = vsyncadd (%p986_p8), %s210_s5, 4294967040  ;;  %s615_s25 = sshll.u32 %s1031_s3, 6  ;;  %s220_s6 = scalar_lea.sflag [#allocation6], %s1031_s3 }
  0x25   : > { %s1045_s8 = scalar_lea.vmem [#allocation5], %s615_s25 }
  0x26   : > { %889 = dma.done.wait (%p986_p8), %s220_s6, 1024  }
  0x27   : > { %891 = vsyncadd (%p986_p8), %s220_s6, 4294966272  ;;  %v270_v0 = vld [vmem:[%s1045_s8 + $0x18] sm:$0xff]  ;;  %v269_v10 = vld [vmem:[%s1045_s8 + $0x10] sm:$0xff]  ;;  %s1063_s21 = scalar_lea.vmem [#allocation7], %s615_s25  ;;  %s644_s15 = sshll.u32 %s910_s12, 6 }
  0x28   : > { %v621_v1 = vld [vmem:[%s1045_s8 + $0x38] sm:$0xff]  ;;  %v285_v2 = vunpack.c.2.s8 %v270_v0  ;;  %v286_v3 = vunpack.c.3.s8 %v270_v0  ;;  %v283_v6 = vunpack.c.0.s8 %v270_v0  ;;  %v284_v7 = vunpack.c.1.s8 %v270_v0  ;;  %v620_v15 = vld [vmem:[%s1045_s8 + $0x30] sm:$0xff]  ;;  %v268_v32 = vld [vmem:[%s1045_s8 + $0x8] sm:$0xff]  ;;  %s477_s20 = scalar_lea.hbm %s1114_s2, %s644_s15  ;;  %s478_s12 = sshll.u32 %s1063_s21, 4  ;;  %s479_s12 = int_to_ptr.vmem [resolvable:$true] %s478_s12 }
  0x29   : > { %v388_v4 = vunpack.c.2.s8 %v621_v1  ;;  %v389_v5 = vunpack.c.3.s8 %v621_v1  ;;  %v386_v8 = vunpack.c.0.s8 %v621_v1  ;;  %v387_v9 = vunpack.c.1.s8 %v621_v1  ;;  %v619_v37 = vld [vmem:[%s1045_s8 + $0x28] sm:$0xff]  ;;  %v267_v51 = vld [vmem:[%s1045_s8] sm:$0xff]  ;;  %s480_s26 = sshll.u32 %s477_s20, 4  ;;  %s462_s19 = scalar_lea.sflag [#allocation4], %s1031_s3  ;;  %s481_s26 = int_to_ptr.hbm [resolvable:$true] %s480_s26 }
  0x2a   : > { %v301_v11 = vcvt.s32.f32 %v285_v2  ;;  %v302_v12 = vcvt.s32.f32 %v286_v3  ;;  %v299_v16 = vcvt.s32.f32 %v283_v6  ;;  %v300_v17 = vcvt.s32.f32 %v284_v7  ;;  %v618_v61 = vld [vmem:[%s1045_s8 + $0x20] sm:$0xff]  ;;  %s846_s27 = sshra.s32 %s481_s26, 4  ;;  %s852_s4 = scalar_lea.hbm %s1114_s2, 128  ;;  %s847_s27 = int_to_ptr.hbm [resolvable:$true] %s846_s27 }
  0x2b   : > { %v404_v13 = vcvt.s32.f32 %v388_v4  ;;  %v405_v14 = vcvt.s32.f32 %v389_v5  ;;  %v402_v18 = vcvt.s32.f32 %v386_v8  ;;  %v403_v19 = vcvt.s32.f32 %v387_v9  ;;  %s848_s28 = scalar_lea.hbm %s847_s27, 64  ;;  %p853_p7 = scmp.lt.s32.totalorder %s847_s27, %s1114_s2 }
  0x2c   : > { %v310_v20 = vpack.c.bf16 %v302_v12, %v301_v11  ;;  %v281_v22 = vunpack.c.2.s8 %v269_v10  ;;  %v282_v23 = vunpack.c.3.s8 %v269_v10  ;;  %v309_v24 = vpack.c.bf16 %v300_v17, %v299_v16  ;;  %v256_v12 = vld [vmem:[%s1035_s7] sm:$0xff]  ;;  %v617_v17 = vld [vmem:[%s1035_s7 + $0x8] sm:$0xff]  ;;  %p849_p4 = scmp.ne.s32.totalorder %s847_s27, %s848_s28  ;;  %p854_p8 = scmp.lt.s32.totalorder %s852_s4, %s848_s28 }
  0x2d   : > { %v413_v21 = vpack.c.bf16 %v405_v14, %v404_v13  ;;  %v412_v25 = vpack.c.bf16 %v403_v19, %v402_v18  ;;  %v384_v26 = vunpack.c.2.s8 %v620_v15  ;;  %v385_v27 = vunpack.c.3.s8 %v620_v15 }
  0x2e   : > { %311 = vmatpush.bf16.msra.mxu0 %v310_v20  ;;  %645 = vmatpush.bf16.msra.mxu2 %v310_v20  ;;  %v297_v28 = vcvt.s32.f32 %v281_v22  ;;  %v298_v29 = vcvt.s32.f32 %v282_v23  ;;  %v279_v30 = vunpack.c.0.s8 %v269_v10  ;;  %v280_v31 = vunpack.c.1.s8 %v269_v10  ;;  %p850_p5 = pnand %p849_p4, %p990_p9  ;;  %p855_p10 = por %p854_p8, %p853_p7 }
  0x2f   : > { %414 = vmatpush.bf16.msra.mxu1 %v413_v21  ;;  %653 = vmatpush.bf16.msra.mxu3 %v413_v21  ;;  %v400_v33 = vcvt.s32.f32 %v384_v26  ;;  %v401_v34 = vcvt.s32.f32 %v385_v27  ;;  %v382_v35 = vunpack.c.0.s8 %v620_v15  ;;  %v383_v36 = vunpack.c.1.s8 %v620_v15 }
  0x30   : > { %v295_v38 = vcvt.s32.f32 %v279_v30  ;;  %v296_v39 = vcvt.s32.f32 %v280_v31  ;;  %v277_v40 = vunpack.c.2.s8 %v268_v32  ;;  %v278_v41 = vunpack.c.3.s8 %v268_v32  ;;  %p851_p6 = pneg %p850_p5 }
  0x31   : > { %v308_v42 = vpack.c.bf16 %v298_v29, %v297_v28  ;;  %v411_v43 = vpack.c.bf16 %v401_v34, %v400_v33  ;;  %v398_v44 = vcvt.s32.f32 %v382_v35  ;;  %v399_v45 = vcvt.s32.f32 %v383_v36 }
  0x32   : > { %312 = vmatpush.bf16.msra.mxu0 %v309_v24  ;;  %646 = vmatpush.bf16.msra.mxu2 %v309_v24  ;;  %v380_v46 = vunpack.c.2.s8 %v619_v37  ;;  %v381_v47 = vunpack.c.3.s8 %v619_v37  ;;  %v307_v48 = vpack.c.bf16 %v296_v39, %v295_v38  ;;  %v293_v49 = vcvt.s32.f32 %v277_v40  ;;  %p856_p13 = pnand %p855_p10, %p851_p6 }
  0x33   : > { %415 = vmatpush.bf16.msra.mxu1 %v412_v25  ;;  %654 = vmatpush.bf16.msra.mxu3 %v412_v25  ;;  %v294_v50 = vcvt.s32.f32 %v278_v41  ;;  %v275_v52 = vunpack.c.0.s8 %v268_v32  ;;  %v276_v53 = vunpack.c.1.s8 %v268_v32  ;;  %v378_v54 = vunpack.c.0.s8 %v619_v37 }
  0x34   : > { %v379_v55 = vunpack.c.1.s8 %v619_v37  ;;  %v410_v56 = vpack.c.bf16 %v399_v45, %v398_v44  ;;  %v396_v57 = vcvt.s32.f32 %v380_v46  ;;  %v397_v58 = vcvt.s32.f32 %v381_v47 }
  0x35   : > { %v273_v59 = vunpack.c.2.s8 %v267_v51  ;;  %v274_v60 = vunpack.c.3.s8 %v267_v51  ;;  %v306_v62 = vpack.c.bf16 %v294_v50, %v293_v49  ;;  %v291_v63 = vcvt.s32.f32 %v275_v52 }
  0x36   : > { %313 = vmatpush.bf16.msra.mxu0 %v308_v42  ;;  %647 = vmatpush.bf16.msra.mxu2 %v308_v42  ;;  %v292_v0 = vcvt.s32.f32 %v276_v53  ;;  %v394_v1 = vcvt.s32.f32 %v378_v54  ;;  %v395_v2 = vcvt.s32.f32 %v379_v55  ;;  %v409_v3 = vpack.c.bf16 %v397_v58, %v396_v57 }
  0x37   : > { %416 = vmatpush.bf16.msra.mxu1 %v411_v43  ;;  %655 = vmatpush.bf16.msra.mxu3 %v411_v43  ;;  %v376_v4 = vunpack.c.2.s8 %v618_v61  ;;  %v377_v5 = vunpack.c.3.s8 %v618_v61  ;;  %v289_v6 = vcvt.s32.f32 %v273_v59  ;;  %v290_v7 = vcvt.s32.f32 %v274_v60 }
  0x38   : > { %v271_v8 = vunpack.c.0.s8 %v267_v51  ;;  %v272_v9 = vunpack.c.1.s8 %v267_v51  ;;  %v305_v10 = vpack.c.bf16 %v292_v0, %v291_v63  ;;  %v408_v11 = vpack.c.bf16 %v395_v2, %v394_v1 }
  0x39   : > { %v392_v13 = vcvt.s32.f32 %v376_v4  ;;  %v393_v14 = vcvt.s32.f32 %v377_v5  ;;  %v374_v15 = vunpack.c.0.s8 %v618_v61  ;;  %v375_v16 = vunpack.c.1.s8 %v618_v61 }
  0x3a   : > { %314 = vmatpush.bf16.msra.mxu0 %v307_v48  ;;  %648 = vmatpush.bf16.msra.mxu2 %v307_v48  ;;  %v304_v18 = vpack.c.bf16 %v290_v7, %v289_v6  ;;  %v287_v19 = vcvt.s32.f32 %v271_v8  ;;  %v288_v20 = vcvt.s32.f32 %v272_v9  ;;  %v257_v21 = vunpack.c.0.s8 %v256_v12 }
  0x3b   : > { %417 = vmatpush.bf16.msra.mxu1 %v410_v56  ;;  %656 = vmatpush.bf16.msra.mxu3 %v410_v56  ;;  %v258_v22 = vunpack.c.1.s8 %v256_v12  ;;  %v259_v23 = vunpack.c.2.s8 %v256_v12  ;;  %v260_v24 = vunpack.c.3.s8 %v256_v12  ;;  %v359_v25 = vunpack.c.0.s8 %v617_v17 }
  0x3c   : > { %v360_v26 = vunpack.c.1.s8 %v617_v17  ;;  %v361_v27 = vunpack.c.2.s8 %v617_v17  ;;  %v362_v28 = vunpack.c.3.s8 %v617_v17  ;;  %v407_v29 = vpack.c.bf16 %v393_v14, %v392_v13 }
  0x3d   : > { %v390_v30 = vcvt.s32.f32 %v374_v15  ;;  %v391_v31 = vcvt.s32.f32 %v375_v16  ;;  %v303_v32 = vpack.c.bf16 %v288_v20, %v287_v19  ;;  %v261_v33 = vcvt.s32.f32 %v257_v21 }
  0x3e   : > { %315 = vmatpush.bf16.msra.mxu0 %v306_v62  ;;  %649 = vmatpush.bf16.msra.mxu2 %v306_v62  ;;  %v262_v34 = vcvt.s32.f32 %v258_v22  ;;  %v263_v35 = vcvt.s32.f32 %v259_v23  ;;  %v264_v36 = vcvt.s32.f32 %v260_v24  ;;  %v363_v37 = vcvt.s32.f32 %v359_v25 }
  0x3f   : > { %418 = vmatpush.bf16.msra.mxu1 %v409_v3  ;;  %657 = vmatpush.bf16.msra.mxu3 %v409_v3  ;;  %v364_v38 = vcvt.s32.f32 %v360_v26  ;;  %v365_v39 = vcvt.s32.f32 %v361_v27  ;;  %v366_v40 = vcvt.s32.f32 %v362_v28  ;;  %v406_v41 = vpack.c.bf16 %v391_v31, %v390_v30 }
  0x40   : > { %v265_v42 = vpack.c.bf16 %v262_v34, %v261_v33  ;;  %v266_v43 = vpack.c.bf16 %v264_v36, %v263_v35 }
  0x41   : > { %v367_v44 = vpack.c.bf16 %v364_v38, %v363_v37  ;;  %v368_v45 = vpack.c.bf16 %v366_v40, %v365_v39 }
  0x42   : > { %316 = vmatpush.bf16.msra.mxu0 %v305_v10  ;;  %650 = vmatpush.bf16.msra.mxu2 %v305_v10 }
  0x43   : > { %419 = vmatpush.bf16.msra.mxu1 %v408_v11  ;;  %658 = vmatpush.bf16.msra.mxu3 %v408_v11 }
  0x46   : > { %317 = vmatpush.bf16.msra.mxu0 %v304_v18  ;;  %651 = vmatpush.bf16.msra.mxu2 %v304_v18 }
  0x47   : > { %420 = vmatpush.bf16.msra.mxu1 %v407_v29  ;;  %659 = vmatpush.bf16.msra.mxu3 %v407_v29 }
  0x4a   : > { %318 = vmatpush.bf16.msra.mxu0 %v303_v32  ;;  %652 = vmatpush.bf16.msra.mxu2 %v303_v32 }
  0x4b   : > { %421 = vmatpush.bf16.msra.mxu1 %v406_v41  ;;  %660 = vmatpush.bf16.msra.mxu3 %v406_v41 }
  0x4d   : > { %319 = vmatmul.bf16.vlgmr.msra.gmra.mxu0 %v265_v42  ;;  %324 = vmatmul.bf16.vlgmr.msra.gmra.mxu2 %v266_v43 }
  0x4e   : > { %422 = vmatmul.bf16.vlgmr.msra.gmra.mxu1 %v367_v44  ;;  %427 = vmatmul.bf16.vlgmr.msra.gmra.mxu3 %v368_v45 }
  0xca   : > { %v320_v46 = vpop.f32.mrf.mxu0 }
  0xcb   : > { %vm661_vm0 = vcmp.lt.s32.totalorder %v320_v46, 0  ;;  %v662_v47 = vceil.f32 %v320_v46  ;;  %v663_v48 = vfloor.f32 %v320_v46  ;;  %v423_v49 = vpop.f32.mrf.mxu1 }
  0xcc   : > { %vm681_vm1 = vcmp.lt.s32.totalorder %v423_v49, 0  ;;  %v682_v50 = vceil.f32 %v423_v49  ;;  %v683_v51 = vfloor.f32 %v423_v49 }
  0xcd   : > { %v664_v52 = vsel %vm661_vm0, %v662_v47, %v663_v48 }
  0xce   : > { %v665_v53 = vcvt.f32.s32 %v664_v52  ;;  %v684_v54 = vsel %vm681_vm1, %v682_v50, %v683_v51 }
  0xcf   : > { %v685_v55 = vcvt.f32.s32 %v684_v54 }
  0xd0   : > { %337 = vst [vmem:[%s1063_s21] sm:$0xff] %v665_v53  ;;  %v325_v56 = vpop.f32.mrf.mxu2 }
  0xd1   : > { %622 = vst [vmem:[%s1063_s21 + $0x20] sm:$0xff] %v685_v55  ;;  %vm671_vm2 = vcmp.lt.s32.totalorder %v325_v56, 0  ;;  %v672_v57 = vceil.f32 %v325_v56  ;;  %v673_v58 = vfloor.f32 %v325_v56  ;;  %v428_v59 = vpop.f32.mrf.mxu3 }
  0xd2   : > { %vm691_vm3 = vcmp.lt.s32.totalorder %v428_v59, 0  ;;  %v692_v60 = vceil.f32 %v428_v59  ;;  %v693_v61 = vfloor.f32 %v428_v59  ;;  %v322_v62 = vpop.f32.mrf.mxu0 }
  0xd3   : > { %v674_v63 = vsel %vm671_vm2, %v672_v57, %v673_v58  ;;  %vm666_vm4 = vcmp.lt.s32.totalorder %v322_v62, 0  ;;  %v667_v0 = vceil.f32 %v322_v62  ;;  %v668_v1 = vfloor.f32 %v322_v62  ;;  %v425_v2 = vpop.f32.mrf.mxu1 }
  0xd4   : > { %v675_v3 = vcvt.f32.s32 %v674_v63  ;;  %v694_v4 = vsel %vm691_vm3, %v692_v60, %v693_v61  ;;  %vm686_vm5 = vcmp.lt.s32.totalorder %v425_v2, 0  ;;  %v687_v5 = vceil.f32 %v425_v2 }
  0xd5   : > { %v695_v6 = vcvt.f32.s32 %v694_v4  ;;  %v669_v7 = vsel %vm666_vm4, %v667_v0, %v668_v1  ;;  %v688_v8 = vfloor.f32 %v425_v2 }
  0xd6   : > { %339 = vst [vmem:[%s1063_s21 + $0x10] sm:$0xff] %v675_v3  ;;  %v670_v9 = vcvt.f32.s32 %v669_v7 }
  0xd7   : > { %624 = vst [vmem:[%s1063_s21 + $0x30] sm:$0xff] %v695_v6  ;;  %v689_v10 = vsel %vm686_vm5, %v687_v5, %v688_v8 }
  0xd8   : > { %338 = vst [vmem:[%s1063_s21 + $0x8] sm:$0xff] %v670_v9  ;;  %v690_v11 = vcvt.f32.s32 %v689_v10  ;;  %v327_v12 = vpop.f32.mrf.mxu2 }
  0xd9   : > { %vm676_vm6 = vcmp.lt.s32.totalorder %v327_v12, 0  ;;  %v677_v13 = vceil.f32 %v327_v12  ;;  %v678_v14 = vfloor.f32 %v327_v12  ;;  %v430_v15 = vpop.f32.mrf.mxu3 }
  0xda   : > { %623 = vst [vmem:[%s1063_s21 + $0x28] sm:$0xff] %v690_v11  ;;  %vm696_vm7 = vcmp.lt.s32.totalorder %v430_v15, 0  ;;  %v697_v16 = vceil.f32 %v430_v15  ;;  %v698_v17 = vfloor.f32 %v430_v15 }
  0xdb   : > { %v679_v18 = vsel %vm676_vm6, %v677_v13, %v678_v14 }
  0xdc   : > { %v680_v19 = vcvt.f32.s32 %v679_v18  ;;  %v699_v20 = vsel %vm696_vm7, %v697_v16, %v698_v17 }
  0xdd   : > { %v700_v21 = vcvt.f32.s32 %v699_v20 }
  0xde   : > { %340 = vst [vmem:[%s1063_s21 + $0x18] sm:$0xff] %v680_v19 }
  0xdf   : > { %625 = vst [vmem:[%s1063_s21 + $0x38] sm:$0xff] %v700_v21 }
  0xe0   : > { %859 = shalt.err (!%p856_p13)
}
  0xe1   : > { %s922_s3 = smov 128   ;;  %s923_s25 = smov 8  }
  0xe2   : > { %705 = dma.vmem_to_hbm [thread:$0]  (%p990_p9), %s479_s12, 1024, %s481_s26, %s462_s19, %s922_s3, %s922_s3, %s923_s25  }
  0xe3 PF: > { %s495_s6 = sand.u32 1, %s898_s9   ;;  %p715_p0 = pnand %p605_p12, %p997_p11 }
  0xe4   : > { %s496_s8 = scalar_lea.sflag [#allocation4], %s495_s6 }
  0xe5   : > { %p716_p1 = pneg %p715_p0 }
  0xe7   : > { %893 = dma.done.wait (%p716_p1), %s496_s8, 1024  }
  0xe8   : > { %895 = vsyncadd (%p716_p1), %s496_s8, 4294966272  ;;  %s21_s14 = sadd.s32 1, %s918_s14   ;;  %s1120_s9 = smov %s902_s10 }
  0xe9   : > { %p18_p2 = scmp.ge.s32.totalorder %s21_s14, 4   ;;  %s1121_s10 = smov %s906_s11 }
  0xea   : > { %s1122_s11 = smov %s995_s23  ;;  %s1123_s12 = smov %s914_s13 }
  0xeb   : > { %s1124_s13 = smov %s1126_s17  ;;  %20 = sbr.rel (!%p18_p2) target bundleno = 8 (0x8), region = 106 }
  0xf0   :  { %502 = vsyncpa [#allocation3], 1 }
  0xf1   :  { %504 = vsyncpa [#allocation3 + $0x1], 1 }
  0xf2   :  { %505 = vsyncpa [#allocation6], 1 }
  0xf3   :  { %507 = vsyncpa [#allocation6 + $0x1], 1 }
  0xf4   :  { %508 = vsyncpa [#allocation4], 1 }
  0xf5   :  { %510 = vsyncpa [#allocation4 + $0x1], 1 }

</bundles_post_ra>
